<compile_context>
chip_gen: v5e
topology: v5e:2x2
jax: 0.10.0
libtpu: 0.0.40
codegen_flags: <defaults>
</compile_context>

<pallas_src>
import functools
import math

import jax
import jax.numpy as jnp
from jax import lax
from jax.experimental import pallas as pl
from jax.experimental.pallas import tpu as pltpu

EPS = 1e-12  # F.normalize default eps


def _round_up(x, m):
    return ((x + m - 1) // m) * m


def _vmem_limit_bytes(estimate):
    # generous margin on the estimate, never above v7x physical VMEM per TC
    return int(min(max(2 * estimate + (4 << 20), 32 << 20), 64 << 20))


# ---------------------------------------------------------------------------
# Kernel 1: shared MLP over the (padded) memory bank + L2 row normalization.
# Grid axis = blocks of the MLP hidden dimension (reduction, "arbitrary").
# ---------------------------------------------------------------------------
def _memory_mlp_kernel(mem_dim, matmul_dtype,
                       mem_ref, w1t_ref, b1_ref, w2t_ref, b2_ref,
                       mnorm_ref, acc_ref):
    k = pl.program_id(0)

    @pl.when(k == 0)
    def _init():
        acc_ref[...] = jnp.zeros_like(acc_ref)

    # layer 1, this hidden block only: relu(mem @ w1t[:, blk] + b1[blk])
    h = jnp.dot(mem_ref[...], w1t_ref[...],
                preferred_element_type=jnp.float32) + b1_ref[...]
    h = jnp.maximum(h, 0.0)                                        # [Mp, TH]

    # layer 2 partial product, accumulated in f32
    acc_ref[...] += jnp.dot(h.astype(matmul_dtype), w2t_ref[...],
                            preferred_element_type=jnp.float32)    # [Mp, S]

    @pl.when(k == pl.num_programs(0) - 1)
    def _finalize():
        mp = jnp.maximum(acc_ref[...] + b2_ref[...], 0.0)          # [Mp, S]
        # x / max(||x||, eps)  ==  x * rsqrt(max(||x||^2, eps^2))
        inv = lax.rsqrt(jnp.maximum(
            jnp.sum(mp * mp, axis=-1, keepdims=True), EPS * EPS))
        mnorm = mp * inv
        # zero the padded memory slots (exist only for lane density)
        row = lax.broadcasted_iota(jnp.int32, mnorm.shape, 0)
        mnorm_ref[...] = jnp.where(row < mem_dim, mnorm, 0.0)


# ---------------------------------------------------------------------------
# Kernel 2: per-row-tile attention read.  Grid axis = N*C row tiles ("parallel").
# ---------------------------------------------------------------------------
def _attention_kernel(mem_dim, shrink_thres, matmul_dtype,
                      x_ref, mnorm_ref, out_ref, att_ref):
    # L2-normalize the input rows in f32
    x = x_ref[...].astype(jnp.float32)                             # [TM, S]
    inv = lax.rsqrt(jnp.maximum(
        jnp.sum(x * x, axis=-1, keepdims=True), EPS * EPS))
    xnorm = (x * inv).astype(matmul_dtype)

    mnorm = mnorm_ref[...]                                         # [Mp, S]

    # logits = xnorm @ mnorm.T without materializing the transpose:
    # contract the last (spatial) dim of both operands.
    logits = lax.dot_general(
        xnorm, mnorm,
        dimension_numbers=(((1,), (1,)), ((), ())),
        preferred_element_type=jnp.float32)                        # [TM, Mp]

    # mask padded memory slots before the softmax
    col = lax.broadcasted_iota(jnp.int32, logits.shape, 1)
    logits = jnp.where(col < mem_dim, logits, -jnp.inf)

    m = jnp.max(logits, axis=-1, keepdims=True)
    e = jnp.exp(logits - m)
    att = e * pl.reciprocal(jnp.sum(e, axis=-1, keepdims=True), approx=True)

    if shrink_thres > 0.0:
        att = jnp.maximum(att - shrink_thres, 0.0)
        att = att * pl.reciprocal(
            jnp.maximum(jnp.sum(att, axis=-1, keepdims=True), EPS), approx=True)

    att_ref[...] = att                                             # lane-dense [TM, Mp]
    out_ref[...] = jnp.dot(att.astype(matmul_dtype), mnorm,
                           preferred_element_type=jnp.float32)     # [TM, S]


# ---------------------------------------------------------------------------
# Wrapper
# ---------------------------------------------------------------------------
def spatial_memory_forward(x, memory, w1, b1, w2, b2,
                           shrink_thres=0.0025,
                           matmul_dtype=jnp.float32,
                           row_tile=None):
    """x: [N, C, H, W]; memory: [M, S] with S == H*W.
    w1: [S//2, S], b1: [S//2], w2: [S, S//2], b2: [S]  (PyTorch Linear layout).
    matmul_dtype: jnp.float32 (exact) or jnp.bfloat16 (HBM-bandwidth win on
    v6e/v7x; normalization/softmax stay in f32)."""
    N, C, H, W = x.shape
    S = H * W
    M = memory.shape[0]
    assert memory.shape[1] == S
    hid = w1.shape[0]
    assert hid == S // 2

    md = jnp.dtype(matmul_dtype)
    f32 = jnp.float32

    NC = N * C
    x_flat = x.reshape(NC, S).astype(f32)              # returned as 'input_flat'

    # ---- static tiling choices ------------------------------------------
    Mp = max(128, _round_up(M, 128))                   # lane-dense attention axis
    if row_tile is None:
        # TODO(synk): shrink on v5e (16 MiB default scoped VMEM / lower HBM BW)
        row_tile = min(256, _round_up(NC, 16))
    TM = int(row_tile)
    NC_pad = _round_up(NC, TM)

    # hidden-dim block for the memory MLP (keeps w1t/w2t blocks small on v7x)
    if hid >= 512 and hid % 512 == 0:
        TH = 512
    elif hid % 128 == 0:
        TH = min(hid, 128)
    else:
        TH = hid
    kt = hid // TH

    # ---- host-side glue: layout only (transpose weights, zero-pad) ------
    w1t = jnp.transpose(w1).astype(md)                 # [S, hid]
    w2t = jnp.transpose(w2).astype(md)                 # [hid, S]
    b1r = b1.reshape(1, hid).astype(f32)
    b2r = b2.reshape(1, S).astype(f32)
    mem_pad = jnp.zeros((Mp, S), md).at[:M].set(memory.astype(md))
    x_pad = jnp.zeros((NC_pad, S), md).at[:NC].set(x_flat.astype(md))

    # ---------------- kernel 1: memory MLP + L2 norm (runs once) ---------
    mlp_flops = 4 * Mp * S * hid
    mlp_bytes = (Mp * S + 2 * S * hid) * md.itemsize + (S + hid) * 4 + Mp * S * 4
    mlp_vmem_est = (2 * Mp * S * md.itemsize
                    + 2 * 2 * S * TH * md.itemsize
                    + 2 * (TH + S) * 4
                    + Mp * S * 4
                    + 2 * Mp * S * 4)

    mnorm_pad_f32 = pl.pallas_call(
        functools.partial(_memory_mlp_kernel, M, md),
        out_shape=jax.ShapeDtypeStruct((Mp, S), f32),
        grid_spec=pltpu.PrefetchScalarGridSpec(
            num_scalar_prefetch=0,
            grid=(kt,),
            in_specs=[
                pl.BlockSpec((Mp, S), lambda k: (0, 0)),   # padded memory
                pl.BlockSpec((S, TH), lambda k: (0, k)),   # w1t column block
                pl.BlockSpec((1, TH), lambda k: (0, k)),   # b1 block
                pl.BlockSpec((TH, S), lambda k: (k, 0)),   # w2t row block
                pl.BlockSpec((1, S), lambda k: (0, 0)),    # b2
            ],
            out_specs=pl.BlockSpec((Mp, S), lambda k: (0, 0)),
            scratch_shapes=[pltpu.VMEM((Mp, S), f32)],
        ),
        compiler_params=pltpu.CompilerParams(
            dimension_semantics=("arbitrary",),
            vmem_limit_bytes=_vmem_limit_bytes(mlp_vmem_est),
        ),
        cost_estimate=pl.CostEstimate(
            flops=int(mlp_flops), transcendentals=int(Mp),
            bytes_accessed=int(mlp_bytes)),
    )(mem_pad, w1t, b1r, w2t, b2r)

    memory_norm = mnorm_pad_f32[:M]                    # module output [M, S]
    mnorm_attn = mnorm_pad_f32.astype(md)              # streamed to kernel 2

    # ---------------- kernel 2: attention over row tiles ------------------
    attn_flops = 4 * NC_pad * Mp * S
    attn_bytes = ((NC_pad * S + Mp * S) * md.itemsize
                  + NC_pad * (S + Mp) * 4)
    attn_vmem_est = (2 * TM * S * md.itemsize          # x tiles (double buffered)
                     + 2 * Mp * S * md.itemsize        # resident normalized memory
                     + 2 * TM * S * 4                  # out tiles
                     + 2 * TM * Mp * 4)                # att tiles

    out_pad, att_pad = pl.pallas_call(
        functools.partial(_attention_kernel, M, float(shrink_thres), md),
        out_shape=(
            jax.ShapeDtypeStruct((NC_pad, S), f32),    # output rows
            jax.ShapeDtypeStruct((NC_pad, Mp), f32),   # raw attention (padded)
        ),
        grid_spec=pltpu.PrefetchScalarGridSpec(
            num_scalar_prefetch=0,
            grid=(NC_pad // TM,),
            in_specs=[
                pl.BlockSpec((TM, S), lambda i: (i, 0)),
                pl.BlockSpec((Mp, S), lambda i: (0, 0)),
            ],
            out_specs=(
                pl.BlockSpec((TM, S), lambda i: (i, 0)),
                pl.BlockSpec((TM, Mp), lambda i: (i, 0)),
            ),
        ),
        compiler_params=pltpu.CompilerParams(
            dimension_semantics=("parallel",),         # shard row tiles (v7x 2 TCs)
            vmem_limit_bytes=_vmem_limit_bytes(attn_vmem_est),
        ),
        cost_estimate=pl.CostEstimate(
            flops=int(attn_flops), transcendentals=int(NC_pad * Mp),
            bytes_accessed=int(attn_bytes)),
    )(x_pad, mnorm_attn)

    out_flat = out_pad[:NC]
    att_weight = att_pad[:NC, :M]

    # glue: reshapes / channel-mean / spatial broadcast (cheap XLA ops)
    output = out_flat.reshape(N, C, H, W)
    att_channel_avg = att_weight.reshape(N, C, M).mean(axis=1)       # [N, M]
    att_spatial = jnp.broadcast_to(att_channel_avg[:, :, None, None], (N, M, H, W))

    return {
        'output': output,
        'att': att_spatial,
        'input_flat': x_flat,
        'memory': memory_norm,
        'raw_attention': att_weight,
    }


# ---------------------------------------------------------------------------
# Pure-JAX reference replicating the PyTorch module exactly.
# ---------------------------------------------------------------------------
def _reference_forward(x, memory, w1, b1, w2, b2, shrink_thres=0.0025):
    N, C, H, W = x.shape
    S = H * W
    M = memory.shape[0]
    xf = x.reshape(N * C, S)
    xn = xf / jnp.maximum(jnp.linalg.norm(xf, axis=1, keepdims=True), EPS)
    h = jnp.maximum(memory @ w1.T + b1, 0.0)
    mp = jnp.maximum(h @ w2.T + b2, 0.0)
    mn = mp / jnp.maximum(jnp.linalg.norm(mp, axis=1, keepdims=True), EPS)
    att = jax.nn.softmax(xn @ mn.T, axis=1)
    if shrink_thres > 0:
        att = jnp.maximum(att - shrink_thres, 0.0)
        att = att / jnp.maximum(jnp.sum(jnp.abs(att), axis=1, keepdims=True), EPS)
    out = (att @ mn).reshape(N, C, H, W)
    att_avg = att.reshape(N, C, M).mean(axis=1)
    att_sp = jnp.broadcast_to(att_avg[:, :, None, None], (N, M, H, W))
    return {'output': out, 'att': att_sp, 'input_flat': xf, 'memory': mn,
            'raw_attention': att}


if __name__ == "__main__":
    # Small deterministic problem: N=2, C=4, H=W=16 -> spatial_dim=256, mem_dim=32
    N, C, H, W = 2, 4, 16, 16
    S = H * W
    M = 32
    shrink_thres = 0.0025

    key = jax.random.PRNGKey(0)
    k_x, k_mem, k_w1, k_b1, k_w2, k_b2 = jax.random.split(key, 6)

    x = jax.random.normal(k_x, (N, C, H, W), dtype=jnp.float32)

    # memory buffer: randn normalized along dim=1 (as in __init__)
    memory = jax.random.normal(k_mem, (M, S), dtype=jnp.float32)
    memory = memory / jnp.maximum(jnp.linalg.norm(memory, axis=1, keepdims=True), EPS)

    # shared_mlp parameters (nn.Linear layout: [out_features, in_features])
    hid = S // 2
    bound1 = 1.0 / math.sqrt(S)
    bound2 = 1.0 / math.sqrt(hid)
    w1 = jax.random.uniform(k_w1, (hid, S), minval=-bound1, maxval=bound1, dtype=jnp.float32)
    b1 = jax.random.uniform(k_b1, (hid,), minval=-bound1, maxval=bound1, dtype=jnp.float32)
    w2 = jax.random.uniform(k_w2, (S, hid), minval=-bound2, maxval=bound2, dtype=jnp.float32)
    b2 = jax.random.uniform(k_b2, (S,), minval=-bound2, maxval=bound2, dtype=jnp.float32)

    ref = _reference_forward(x, memory, w1, b1, w2, b2, shrink_thres)
    keys_to_check = ('output', 'att', 'memory', 'raw_attention', 'input_flat')

    # --- f32 matmuls: tolerance relaxed (deliberately) to 2e-3 because the
    #     softmax / L1-renorm denominators use the EUP approx reciprocal.
    res_f32 = spatial_memory_forward(x, memory, w1, b1, w2, b2, shrink_thres,
                                     matmul_dtype=jnp.float32)
    jax.block_until_ready(res_f32)
    for kname in keys_to_check:
        a, b = res_f32[kname], ref[kname]
        assert a.shape == b.shape, (kname, a.shape, b.shape)
        assert jnp.allclose(a, b, atol=2e-3, rtol=2e-3), ("f32", kname)

    # --- bf16 streaming of x / memory / weights (v6e/v7x bandwidth win);
    #     checked at bf16-class tolerance.
    res_bf16 = spatial_memory_forward(x, memory, w1, b1, w2, b2, shrink_thres,
                                      matmul_dtype=jnp.bfloat16)
    jax.block_until_ready(res_bf16)
    for kname in keys_to_check:
        a, b = res_bf16[kname], ref[kname]
        assert a.shape == b.shape, (kname, a.shape, b.shape)
        assert jnp.allclose(a, b, atol=5e-2, rtol=5e-2), ("bf16", kname)

    print("KERNEL_OK")
</pallas_src>

<mosaic_0001>
module attributes {stable_mosaic.version = 11 : i64} {
  func.func @_memory_mlp_kernel(%arg0: i32, %arg1: memref<128x256xf32, #tpu.memory_space<vmem>>, %arg2: memref<256x128xf32, #tpu.memory_space<vmem>>, %arg3: memref<1x128xf32, #tpu.memory_space<vmem>>, %arg4: memref<128x256xf32, #tpu.memory_space<vmem>>, %arg5: memref<1x256xf32, #tpu.memory_space<vmem>>, %arg6: memref<128x256xf32, #tpu.memory_space<vmem>>, %arg7: memref<128x256xf32, #tpu.memory_space<vmem>>) attributes {dimension_semantics = [#tpu.dimension_semantics<arbitrary>], iteration_bounds = array<i64: 1>, scalar_prefetch = 0 : i64, scratch_operands = 1 : i64, tpu.core_type = #tpu.core_type<tc>, window_params = [{pipeline_mode = #tpu.pipeline_mode<synchronous>, transform_indices = @transform_0, window_bounds = array<i64: 128, 256>}, {transform_indices = @transform_1, window_bounds = array<i64: 256, 128>}, {transform_indices = @transform_2, window_bounds = array<i64: 1, 128>}, {transform_indices = @transform_3, window_bounds = array<i64: 128, 256>}, {pipeline_mode = #tpu.pipeline_mode<synchronous>, transform_indices = @transform_4, window_bounds = array<i64: 1, 256>}, {pipeline_mode = #tpu.pipeline_mode<synchronous>, transform_indices = @transform_5, window_bounds = array<i64: 128, 256>}]} {
    %c0_i32 = arith.constant 0 : i32
    %0 = arith.cmpi eq, %arg0, %c0_i32 : i32
    %1 = arith.extui %0 : i1 to i32
    %c0_i32_0 = arith.constant 0 : i32
    %2 = arith.cmpi ne, %1, %c0_i32_0 : i32
    scf.if %2 {
      %cst_16 = arith.constant 0.000000e+00 : f32
      %19 = vector.broadcast %cst_16 : f32 to vector<128x256xf32>
      %c0_17 = arith.constant 0 : index
      %c0_18 = arith.constant 0 : index
      %20 = vector.load %arg7[%c0_17, %c0_18] : memref<128x256xf32, #tpu.memory_space<vmem>>, vector<128x256xf32>
      tpu.vector_store %arg7[%c0_17, %c0_18], %19 {strides = array<i32>} : memref<128x256xf32, #tpu.memory_space<vmem>>, vector<128x256xf32>,
    } else {
    }
    %c0 = arith.constant 0 : index
    %c0_1 = arith.constant 0 : index
    %3 = vector.load %arg1[%c0, %c0_1] : memref<128x256xf32, #tpu.memory_space<vmem>>, vector<128x256xf32>
    %c0_2 = arith.constant 0 : index
    %c0_3 = arith.constant 0 : index
    %4 = vector.load %arg2[%c0_2, %c0_3] : memref<256x128xf32, #tpu.memory_space<vmem>>, vector<256x128xf32>
    %cst = arith.constant dense<0.000000e+00> : vector<128x128xf32>
    %5 = tpu.matmul %3, %4, %cst {dimension_numbers = #tpu.dot_dimension_numbers<[1], [0], [0], [1], [0, 0, 1, 1], [], []>} : vector<128x256xf32>, vector<256x128xf32>, vector<128x128xf32> -> vector<128x128xf32>
    %c0_4 = arith.constant 0 : index
    %c0_5 = arith.constant 0 : index
    %6 = vector.load %arg3[%c0_4, %c0_5] : memref<1x128xf32, #tpu.memory_space<vmem>>, vector<1x128xf32>
    %7 = vector.broadcast %6 : vector<1x128xf32> to vector<128x128xf32>
    %8 = arith.addf %5, %7 : vector<128x128xf32>
    %cst_6 = arith.constant 0.000000e+00 : f32
    %9 = vector.broadcast %cst_6 : f32 to vector<128x128xf32>
    %10 = arith.maximumf %8, %9 : vector<128x128xf32>
    %c0_7 = arith.constant 0 : index
    %c0_8 = arith.constant 0 : index
    %11 = vector.load %arg7[%c0_7, %c0_8] : memref<128x256xf32, #tpu.memory_space<vmem>>, vector<128x256xf32>
    %c0_9 = arith.constant 0 : index
    %c0_10 = arith.constant 0 : index
    %12 = vector.load %arg4[%c0_9, %c0_10] : memref<128x256xf32, #tpu.memory_space<vmem>>, vector<128x256xf32>
    %cst_11 = arith.constant dense<0.000000e+00> : vector<128x256xf32>
    %13 = tpu.matmul %10, %12, %cst_11 {dimension_numbers = #tpu.dot_dimension_numbers<[1], [0], [0], [1], [0, 0, 1, 1], [], []>} : vector<128x128xf32>, vector<128x256xf32>, vector<128x256xf32> -> vector<128x256xf32>
    %14 = arith.addf %11, %13 : vector<128x256xf32>
    %c0_12 = arith.constant 0 : index
    %c0_13 = arith.constant 0 : index
    %15 = vector.load %arg7[%c0_12, %c0_13] : memref<128x256xf32, #tpu.memory_space<vmem>>, vector<128x256xf32>
    tpu.vector_store %arg7[%c0_12, %c0_13], %14 {strides = array<i32>} : memref<128x256xf32, #tpu.memory_space<vmem>>, vector<128x256xf32>,
    %c0_i32_14 = arith.constant 0 : i32
    %16 = arith.cmpi eq, %arg0, %c0_i32_14 : i32
    %17 = arith.extui %16 : i1 to i32
    %c0_i32_15 = arith.constant 0 : i32
    %18 = arith.cmpi ne, %17, %c0_i32_15 : i32
    scf.if %18 {
      %c0_16 = arith.constant 0 : index
      %c0_17 = arith.constant 0 : index
      %19 = vector.load %arg7[%c0_16, %c0_17] : memref<128x256xf32, #tpu.memory_space<vmem>>, vector<128x256xf32>
      %c0_18 = arith.constant 0 : index
      %c0_19 = arith.constant 0 : index
      %20 = vector.load %arg5[%c0_18, %c0_19] : memref<1x256xf32, #tpu.memory_space<vmem>>, vector<1x256xf32>
      %21 = vector.broadcast %20 : vector<1x256xf32> to vector<128x256xf32>
      %22 = arith.addf %19, %21 : vector<128x256xf32>
      %cst_20 = arith.constant 0.000000e+00 : f32
      %23 = vector.broadcast %cst_20 : f32 to vector<128x256xf32>
      %24 = arith.maximumf %22, %23 : vector<128x256xf32>
      %25 = arith.mulf %24, %24 : vector<128x256xf32>
      %cst_21 = arith.constant dense<0.000000e+00> : vector<128xf32>
      %26 = vector.multi_reduction <add>, %25, %cst_21 [1] : vector<128x256xf32> to vector<128xf32>
      %27 = vector.shape_cast %26 : vector<128xf32> to vector<128x1xf32>
      %cst_22 = arith.constant 1.000000e-24 : f32
      %28 = vector.broadcast %cst_22 : f32 to vector<128x1xf32>
      %29 = arith.maximumf %27, %28 : vector<128x1xf32>
      %30 = math.rsqrt %29 : vector<128x1xf32>
      %31 = vector.broadcast %30 : vector<128x1xf32> to vector<128x256xf32>
      %32 = arith.mulf %24, %31 : vector<128x256xf32>
      %33 = tpu.iota {dimensions = array<i32: 0>} : vector<128x256xi32>
      %c32_i32 = arith.constant 32 : i32
      %34 = vector.broadcast %c32_i32 : i32 to vector<128x256xi32>
      %35 = arith.cmpi slt, %33, %34 : vector<128x256xi32>
      %cst_23 = arith.constant 0.000000e+00 : f32
      %36 = vector.broadcast %cst_23 : f32 to vector<128x256xf32>
      %37 = arith.select %35, %32, %36 : vector<128x256xi1>, vector<128x256xf32>
      %c0_24 = arith.constant 0 : index
      %c0_25 = arith.constant 0 : index
      %38 = vector.load %arg6[%c0_24, %c0_25] : memref<128x256xf32, #tpu.memory_space<vmem>>, vector<128x256xf32>
      tpu.vector_store %arg6[%c0_24, %c0_25], %37 {strides = array<i32>} : memref<128x256xf32, #tpu.memory_space<vmem>>, vector<128x256xf32>,
    } else {
    }
    return
  }
  func.func @transform_0(%arg0: i32) -> (i32, i32) {
    %c0_i32 = arith.constant 0 : i32
    %c0_i32_0 = arith.constant 0 : i32
    %c0_i32_1 = arith.constant 0 : i32
    return %c0_i32, %c0_i32_0 : i32, i32
  }
  func.func @transform_1(%arg0: i32) -> (i32, i32) {
    %c0_i32 = arith.constant 0 : i32
    %c0_i32_0 = arith.constant 0 : i32
    return %c0_i32, %arg0 : i32, i32
  }
  func.func @transform_2(%arg0: i32) -> (i32, i32) {
    %c0_i32 = arith.constant 0 : i32
    %c0_i32_0 = arith.constant 0 : i32
    return %c0_i32, %arg0 : i32, i32
  }
  func.func @transform_3(%arg0: i32) -> (i32, i32) {
    %c0_i32 = arith.constant 0 : i32
    %c0_i32_0 = arith.constant 0 : i32
    return %arg0, %c0_i32 : i32, i32
  }
  func.func @transform_4(%arg0: i32) -> (i32, i32) {
    %c0_i32 = arith.constant 0 : i32
    %c0_i32_0 = arith.constant 0 : i32
    %c0_i32_1 = arith.constant 0 : i32
    return %c0_i32, %c0_i32_0 : i32, i32
  }
  func.func @transform_5(%arg0: i32) -> (i32, i32) {
    %c0_i32 = arith.constant 0 : i32
    %c0_i32_0 = arith.constant 0 : i32
    %c0_i32_1 = arith.constant 0 : i32
    return %c0_i32, %c0_i32_0 : i32, i32
  }
}

</mosaic_0001>

<bundles_post_ra>
// kernel: tpu_custom_call.1
= control target key start
LH: loop header
LB: loop body
LE: loop exit
PB: predicated region body
PF: predicated region fallthrough
CT: control target
= control target key end

     0   :  { %10 = vsyncpa [#allocation4], 0  ;;  %s1354_s0 = inlined_call_operand.hbm [shape: f32[128,256], index: 0, kind: input, shape index: {}]   ;;  %s1355_s1 = inlined_call_operand.hbm [shape: f32[256,128], index: 1, kind: input, shape index: {}]   ;;  %s1356_s2 = inlined_call_operand.vmem [shape: f32[1,128], index: 2, kind: input, shape index: {}]   ;;  %s1357_s3 = inlined_call_operand.hbm [shape: f32[128,256], index: 3, kind: input, shape index: {}]   ;;  %s1358_s4 = inlined_call_operand.vmem [shape: f32[1,256], index: 4, kind: input, shape index: {}]   ;;  %s1359_s5 = inlined_call_operand.hbm [shape: f32[128,256], index: 5, kind: output, shape index: {}]  }
   0x1   :  { %11 = vsyncpa [#allocation7], 0  ;;  %s30_s20 = sshll.u32 %s1355_s1, 4  ;;  %s31_s20 = int_to_ptr.hbm [resolvable:$true] %s30_s20 }
   0x2   :  { %12 = vsyncpa [#allocation5], 0  ;;  %s1206_s21 = smov [#allocation6]   ;;  %s17_s25 = sshll.u32 %s1354_s0, 4  ;;  %s18_s25 = int_to_ptr.hbm [resolvable:$true] %s17_s25 }
   0x3   :  { %s32_s22 = sshll.u32 %s1206_s21, 4  ;;  %s1207_s26 = smov 128   ;;  %s33_s22 = int_to_ptr.vmem [resolvable:$true] %s32_s22 }
   0x4   :  { %s1208_s27 = smov 8   ;;  %s1209_s28 = smov [#allocation3]  }
   0x5   :  { %38 = dma.hbm_to_vmem [thread:$0]  %s31_s20, 4096, %s33_s22, [#allocation7], %s1207_s26, %s1207_s26, %s1208_s27  }
   0x6   :  { %s19_s29 = sshll.u32 %s1209_s28, 4  ;;  %s1210_s30 = smov 256   ;;  %s20_s29 = int_to_ptr.vmem [resolvable:$true] %s19_s29 }
   0x7   :  { %s1211_s6 = smov 16   ;;  %s45_s8 = sshll.u32 %s1357_s3, 4  ;;  %s46_s8 = int_to_ptr.hbm [resolvable:$true] %s45_s8 }
   0x8   :  { %25 = dma.hbm_to_vmem [thread:$0]  %s18_s25, 4096, %s20_s29, [#allocation4], %s1210_s30, %s1210_s30, %s1211_s6  }
   0x9   :  { %s1212_s9 = smov [#allocation8]  }
   0xa   :  { %s47_s0 = sshll.u32 %s1212_s9, 4  ;;  %s48_s0 = int_to_ptr.vmem [resolvable:$true] %s47_s0 }
   0xb   :  { %53 = dma.hbm_to_vmem [thread:$0]  %s46_s8, 4096, %s48_s0, [#allocation7], %s1210_s30, %s1210_s30, %s1211_s6  }
   0xc   :  { %1200 = dma.done.wait [#allocation4], 4096  }
   0xd   :  { %1201 = vsyncadd [#allocation4], 4294963200 }
   0xe   :  { %1202 = dma.done.wait [#allocation7], 8192  }
   0xf   :  { %1203 = vsyncadd [#allocation7], 4294959104  ;;  %v151_v0 = vld [vmem:[#allocation6 + $0x78] sm:$0xff]  ;;  %v150_v1 = vld [vmem:[#allocation6 + $0x70] sm:$0xff]  ;;  %s1072_s15 = sshll.u32 %s1359_s5, 4  ;;  %s1073_s15 = int_to_ptr.hbm [resolvable:$true] %s1072_s15 }
  0x10   :  { %v167_v2 = vld [vmem:[#allocation6 + $0xf8] sm:$0xff]  ;;  %172 = vmatpush.msra.mxu0 %v151_v0  ;;  %v166_v3 = vld [vmem:[#allocation6 + $0xf0] sm:$0xff]  ;;  %v149_v4 = vld [vmem:[#allocation6 + $0x68] sm:$0xff] }
  0x11   :  { %237 = vmatpush.msra.mxu1 %v167_v2  ;;  %v165_v5 = vld [vmem:[#allocation6 + $0xe8] sm:$0xff]  ;;  %v148_v6 = vld [vmem:[#allocation6 + $0x60] sm:$0xff]  ;;  %v147_v8 = vld [vmem:[#allocation6 + $0x58] sm:$0xff] }
  0x12   :  { %173 = vmatpush.msra.mxu0 %v150_v1  ;;  %v164_v7 = vld [vmem:[#allocation6 + $0xe0] sm:$0xff]  ;;  %v163_v9 = vld [vmem:[#allocation6 + $0xd8] sm:$0xff]  ;;  %v146_v10 = vld [vmem:[#allocation6 + $0x50] sm:$0xff] }
  0x13   :  { %238 = vmatpush.msra.mxu1 %v166_v3  ;;  %v162_v11 = vld [vmem:[#allocation6 + $0xd0] sm:$0xff]  ;;  %v145_v12 = vld [vmem:[#allocation6 + $0x48] sm:$0xff]  ;;  %v144_v14 = vld [vmem:[#allocation6 + $0x40] sm:$0xff] }
  0x14   :  { %174 = vmatpush.msra.mxu0 %v149_v4  ;;  %v161_v13 = vld [vmem:[#allocation6 + $0xc8] sm:$0xff]  ;;  %v160_v15 = vld [vmem:[#allocation6 + $0xc0] sm:$0xff]  ;;  %v143_v16 = vld [vmem:[#allocation6 + $0x38] sm:$0xff] }
  0x15   :  { %239 = vmatpush.msra.mxu1 %v165_v5  ;;  %v159_v17 = vld [vmem:[#allocation6 + $0xb8] sm:$0xff]  ;;  %v142_v18 = vld [vmem:[#allocation6 + $0x30] sm:$0xff]  ;;  %v141_v20 = vld [vmem:[#allocation6 + $0x28] sm:$0xff] }
  0x16   :  { %175 = vmatpush.msra.mxu0 %v148_v6  ;;  %v158_v19 = vld [vmem:[#allocation6 + $0xb0] sm:$0xff]  ;;  %v157_v21 = vld [vmem:[#allocation6 + $0xa8] sm:$0xff]  ;;  %v140_v22 = vld [vmem:[#allocation6 + $0x20] sm:$0xff] }
  0x17   :  { %240 = vmatpush.msra.mxu1 %v164_v7  ;;  %v156_v23 = vld [vmem:[#allocation6 + $0xa0] sm:$0xff]  ;;  %v139_v24 = vld [vmem:[#allocation6 + $0x18] sm:$0xff]  ;;  %v138_v26 = vld [vmem:[#allocation6 + $0x10] sm:$0xff] }
  0x18   :  { %176 = vmatpush.msra.mxu0 %v147_v8  ;;  %v155_v25 = vld [vmem:[#allocation6 + $0x98] sm:$0xff]  ;;  %v154_v27 = vld [vmem:[#allocation6 + $0x90] sm:$0xff]  ;;  %v137_v28 = vld [vmem:[#allocation6 + $0x8] sm:$0xff] }
  0x19   :  { %241 = vmatpush.msra.mxu1 %v163_v9  ;;  %v153_v29 = vld [vmem:[#allocation6 + $0x88] sm:$0xff]  ;;  %v136_v30 = vld [vmem:[#allocation6] sm:$0xff]  ;;  %v106_v34 = vld [vmem:[#allocation3 + $0x10] sm:$0xff] }
  0x1a   :  { %177 = vmatpush.msra.mxu0 %v146_v10  ;;  %v152_v31 = vld [vmem:[#allocation6 + $0x80] sm:$0xff]  ;;  %v105_v33 = vld [vmem:[#allocation3 + $0x8] sm:$0xff]  ;;  %v107_v35 = vld [vmem:[#allocation3 + $0x18] sm:$0xff] }
  0x1b   :  { %242 = vmatpush.msra.mxu1 %v162_v11  ;;  %v104_v32 = vld [vmem:[#allocation3] sm:$0xff]  ;;  %v109_v37 = vld [vmem:[#allocation3 + $0x28] sm:$0xff]  ;;  %v380_v38 = vld [vmem:[#allocation8 + $0xf0] sm:$0xff] }
  0x1c   :  { %178 = vmatpush.msra.mxu0 %v145_v12  ;;  %v108_v36 = vld [vmem:[#allocation3 + $0x20] sm:$0xff]  ;;  %v381_v39 = vld [vmem:[#allocation8 + $0xf8] sm:$0xff]  ;;  %382 = vmatpush.msra.mxu2 %v380_v38  ;;  %v379_v41 = vld [vmem:[#allocation8 + $0xe8] sm:$0xff] }
  0x1d   :  { %243 = vmatpush.msra.mxu1 %v161_v13  ;;  %447 = vmatpush.msra.mxu3 %v381_v39  ;;  %v378_v40 = vld [vmem:[#allocation8 + $0xe0] sm:$0xff]  ;;  %v376_v42 = vld [vmem:[#allocation8 + $0xd0] sm:$0xff]  ;;  %v377_v43 = vld [vmem:[#allocation8 + $0xd8] sm:$0xff] }
  0x1e   :  { %179 = vmatpush.msra.mxu0 %v144_v14  ;;  %383 = vmatpush.msra.mxu2 %v378_v40  ;;  %v374_v44 = vld [vmem:[#allocation8 + $0xc0] sm:$0xff]  ;;  %v375_v45 = vld [vmem:[#allocation8 + $0xc8] sm:$0xff]  ;;  %v110_v46 = vld [vmem:[#allocation3 + $0x30] sm:$0xff] }
  0x1f   :  { %244 = vmatpush.msra.mxu1 %v160_v15  ;;  %448 = vmatpush.msra.mxu3 %v379_v41  ;;  %v111_v47 = vld [vmem:[#allocation3 + $0x38] sm:$0xff]  ;;  %v372_v48 = vld [vmem:[#allocation8 + $0xb0] sm:$0xff]  ;;  %v370_v50 = vld [vmem:[#allocation8 + $0xa0] sm:$0xff] }
  0x20   :  { %180 = vmatpush.msra.mxu0 %v143_v16  ;;  %384 = vmatpush.msra.mxu2 %v376_v42  ;;  %v373_v49 = vld [vmem:[#allocation8 + $0xb8] sm:$0xff]  ;;  %v371_v51 = vld [vmem:[#allocation8 + $0xa8] sm:$0xff]  ;;  %v368_v52 = vld [vmem:[#allocation8 + $0x90] sm:$0xff] }
  0x21   :  { %245 = vmatpush.msra.mxu1 %v159_v17  ;;  %449 = vmatpush.msra.mxu3 %v377_v43  ;;  %v369_v53 = vld [vmem:[#allocation8 + $0x98] sm:$0xff]  ;;  %v366_v54 = vld [vmem:[#allocation8 + $0x80] sm:$0xff]  ;;  %v367_v55 = vld [vmem:[#allocation8 + $0x88] sm:$0xff] }
  0x22   :  { %181 = vmatpush.msra.mxu0 %v142_v18  ;;  %385 = vmatpush.msra.mxu2 %v374_v44  ;;  %v112_v56 = vld [vmem:[#allocation3 + $0x40] sm:$0xff]  ;;  %v113_v57 = vld [vmem:[#allocation3 + $0x48] sm:$0xff]  ;;  %v364_v58 = vld [vmem:[#allocation8 + $0x70] sm:$0xff] }
  0x23   :  { %246 = vmatpush.msra.mxu1 %v158_v19  ;;  %450 = vmatpush.msra.mxu3 %v375_v45  ;;  %v365_v59 = vld [vmem:[#allocation8 + $0x78] sm:$0xff]  ;;  %v362_v60 = vld [vmem:[#allocation8 + $0x60] sm:$0xff]  ;;  %v363_v61 = vld [vmem:[#allocation8 + $0x68] sm:$0xff] }
  0x24   :  { %182 = vmatpush.msra.mxu0 %v141_v20  ;;  %386 = vmatpush.msra.mxu2 %v372_v48  ;;  %v360_v62 = vld [vmem:[#allocation8 + $0x50] sm:$0xff]  ;;  %v361_v63 = vld [vmem:[#allocation8 + $0x58] sm:$0xff]  ;;  %v358_v0 = vld [vmem:[#allocation8 + $0x40] sm:$0xff] }
  0x25   :  { %247 = vmatpush.msra.mxu1 %v157_v21  ;;  %451 = vmatpush.msra.mxu3 %v373_v49  ;;  %v359_v1 = vld [vmem:[#allocation8 + $0x48] sm:$0xff]  ;;  %v114_v2 = vld [vmem:[#allocation3 + $0x50] sm:$0xff]  ;;  %v115_v3 = vld [vmem:[#allocation3 + $0x58] sm:$0xff] }
  0x26   :  { %183 = vmatpush.msra.mxu0 %v140_v22  ;;  %387 = vmatpush.msra.mxu2 %v370_v50  ;;  %v116_v4 = vld [vmem:[#allocation3 + $0x60] sm:$0xff]  ;;  %v117_v5 = vld [vmem:[#allocation3 + $0x68] sm:$0xff]  ;;  %v118_v6 = vld [vmem:[#allocation3 + $0x70] sm:$0xff] }
  0x27   :  { %248 = vmatpush.msra.mxu1 %v156_v23  ;;  %452 = vmatpush.msra.mxu3 %v371_v51  ;;  %v119_v7 = vld [vmem:[#allocation3 + $0x78] sm:$0xff]  ;;  %v120_v8 = vld [vmem:[#allocation3 + $0x80] sm:$0xff]  ;;  %v121_v9 = vld [vmem:[#allocation3 + $0x88] sm:$0xff] }
  0x28   :  { %184 = vmatpush.msra.mxu0 %v139_v24  ;;  %388 = vmatpush.msra.mxu2 %v368_v52  ;;  %v122_v10 = vld [vmem:[#allocation3 + $0x90] sm:$0xff]  ;;  %v357_v12 = vld [vmem:[#allocation8 + $0x38] sm:$0xff]  ;;  %v354_v14 = vld [vmem:[#allocation8 + $0x20] sm:$0xff] }
  0x29   :  { %249 = vmatpush.msra.mxu1 %v155_v25  ;;  %453 = vmatpush.msra.mxu3 %v369_v53  ;;  %v356_v11 = vld [vmem:[#allocation8 + $0x30] sm:$0xff]  ;;  %v123_v13 = vld [vmem:[#allocation3 + $0x98] sm:$0xff]  ;;  %v355_v15 = vld [vmem:[#allocation8 + $0x28] sm:$0xff] }
  0x2a   :  { %185 = vmatpush.msra.mxu0 %v138_v26  ;;  %389 = vmatpush.msra.mxu2 %v366_v54  ;;  %v352_v16 = vld [vmem:[#allocation8 + $0x10] sm:$0xff]  ;;  %v353_v17 = vld [vmem:[#allocation8 + $0x18] sm:$0xff]  ;;  %v350_v18 = vld [vmem:[#allocation8] sm:$0xff] }
  0x2b   :  { %250 = vmatpush.msra.mxu1 %v154_v27  ;;  %454 = vmatpush.msra.mxu3 %v367_v55  ;;  %v351_v19 = vld [vmem:[#allocation8 + $0x8] sm:$0xff]  ;;  %v124_v20 = vld [vmem:[#allocation3 + $0xa0] sm:$0xff]  ;;  %v126_v22 = vld [vmem:[#allocation3 + $0xb0] sm:$0xff] }
  0x2c   :  { %186 = vmatpush.msra.mxu0 %v137_v28  ;;  %390 = vmatpush.msra.mxu2 %v364_v58  ;;  %v125_v21 = vld [vmem:[#allocation3 + $0xa8] sm:$0xff]  ;;  %v127_v23 = vld [vmem:[#allocation3 + $0xb8] sm:$0xff]  ;;  %v128_v24 = vld [vmem:[#allocation3 + $0xc0] sm:$0xff] }
  0x2d   :  { %251 = vmatpush.msra.mxu1 %v153_v29  ;;  %455 = vmatpush.msra.mxu3 %v365_v59  ;;  %v129_v25 = vld [vmem:[#allocation3 + $0xc8] sm:$0xff]  ;;  %v1263_v26 = vld [vmem:[%s1356_s2] ss:$0 sm:$0xff]  ;;  %v130_v27 = vld [vmem:[#allocation3 + $0xd0] sm:$0xff] }
  0x2e   :  { %187 = vmatpush.msra.mxu0 %v136_v30  ;;  %391 = vmatpush.msra.mxu2 %v362_v60  ;;  %v131_v28 = vld [vmem:[#allocation3 + $0xd8] sm:$0xff]  ;;  %v134_v41 = vld [vmem:[#allocation3 + $0xf0] sm:$0xff] }
  0x2f   :  { %252 = vmatpush.msra.mxu1 %v152_v31  ;;  %188 = vmatmul.f32.vlgmr.msra.gmra.mxu0 %v104_v32  ;;  %v135_v42 = vld [vmem:[#allocation3 + $0xf8] sm:$0xff] }
  0x30   :  { %253 = vmatmul.f32.vlgmr.msra.gmra.mxu1 %v105_v33  ;;  %456 = vmatpush.msra.mxu3 %v363_v61 }
  0x31   :  { %392 = vmatpush.msra.mxu2 %v360_v62 }
  0x32   :  { %457 = vmatpush.msra.mxu3 %v361_v63 }
  0x33   :  { %393 = vmatpush.msra.mxu2 %v358_v0 }
  0x34   :  { %458 = vmatpush.msra.mxu3 %v359_v1 }
  0x35   :  { %394 = vmatpush.msra.mxu2 %v356_v11 }
  0x36   :  { %459 = vmatpush.msra.mxu3 %v357_v12 }
  0x37   :  { %191 = vmatmul.f32.gmra.mxu0 %v106_v34  ;;  %395 = vmatpush.msra.mxu2 %v354_v14  ;;  %v132_v34 = vld [vmem:[#allocation3 + $0xe0] sm:$0xff] }
  0x38   :  { %256 = vmatmul.f32.gmra.mxu1 %v107_v35  ;;  %460 = vmatpush.msra.mxu3 %v355_v15  ;;  %v133_v35 = vld [vmem:[#allocation3 + $0xe8] sm:$0xff] }
  0x39   :  { %396 = vmatpush.msra.mxu2 %v352_v16 }
  0x3a   :  { %461 = vmatpush.msra.mxu3 %v353_v17 }
  0x3b   :  { %397 = vmatpush.msra.mxu2 %v350_v18 }
  0x3c   :  { %462 = vmatpush.msra.mxu3 %v351_v19 }
  0x3f   :  { %194 = vmatmul.f32.gmra.mxu0 %v108_v36 }
  0x40   :  { %259 = vmatmul.f32.gmra.mxu1 %v109_v37 }
  0x47   :  { %197 = vmatmul.f32.gmra.mxu0 %v110_v46 }
  0x48   :  { %262 = vmatmul.f32.gmra.mxu1 %v111_v47 }
  0x4f   :  { %200 = vmatmul.f32.gmra.mxu0 %v112_v56 }
  0x50   :  { %265 = vmatmul.f32.gmra.mxu1 %v113_v57 }
  0x57   :  { %203 = vmatmul.f32.gmra.mxu0 %v114_v2 }
  0x58   :  { %268 = vmatmul.f32.gmra.mxu1 %v115_v3 }
  0x5f   :  { %206 = vmatmul.f32.gmra.mxu0 %v116_v4 }
  0x60   :  { %271 = vmatmul.f32.gmra.mxu1 %v117_v5 }
  0x67   :  { %209 = vmatmul.f32.gmra.mxu0 %v118_v6 }
  0x68   :  { %274 = vmatmul.f32.gmra.mxu1 %v119_v7 }
  0x6f   :  { %212 = vmatmul.f32.gmra.mxu0 %v120_v8 }
  0x70   :  { %277 = vmatmul.f32.gmra.mxu1 %v121_v9 }
  0x77   :  { %215 = vmatmul.f32.gmra.mxu0 %v122_v10 }
  0x78   :  { %280 = vmatmul.f32.gmra.mxu1 %v123_v13 }
  0x7f   :  { %218 = vmatmul.f32.gmra.mxu0 %v124_v20 }
  0x80   :  { %283 = vmatmul.f32.gmra.mxu1 %v125_v21 }
  0x87   :  { %221 = vmatmul.f32.gmra.mxu0 %v126_v22 }
  0x88   :  { %286 = vmatmul.f32.gmra.mxu1 %v127_v23 }
  0x8f   :  { %224 = vmatmul.f32.gmra.mxu0 %v128_v24 }
  0x90   :  { %289 = vmatmul.f32.gmra.mxu1 %v129_v25 }
  0x97   :  { %227 = vmatmul.f32.gmra.mxu0 %v130_v27 }
  0x98   :  { %292 = vmatmul.f32.gmra.mxu1 %v131_v28 }
  0x9f   :  { %230 = vmatmul.f32.gmra.mxu0 %v132_v34 }
  0xa0   :  { %295 = vmatmul.f32.gmra.mxu1 %v133_v35 }
  0xa7   :  { %233 = vmatmul.f32.gmra.mxu0 %v134_v41 }
  0xa8   :  { %298 = vmatmul.f32.gmra.mxu1 %v135_v42 }
  0xac   :  { %v189_v29 = vpop.f32.mrf.mxu0 }
  0xad   :  { %v254_v30 = vpop.f32.mrf.mxu1  ;;  %v190_v31 = vadd.f32 %v1263_v26, %v189_v29 }
  0xaf   :  { %v255_v32 = vadd.f32 %v254_v30, %v190_v31 }
  0xb1   :  { %v302_v33 = vmax.f32 %v255_v32, 0.0 }
  0xb3   :  { %398 = vmatmul.f32.vlgmr.msra.gmra.mxu2 %v302_v33  ;;  %463 = vmatmul.f32.vlgmr.msra.gmra.mxu3 %v302_v33 }
  0xb4   :  { %v192_v36 = vpop.f32.mrf.mxu0 }
  0xb5   :  { %v257_v37 = vpop.f32.mrf.mxu1  ;;  %v193_v38 = vadd.f32 %v1263_v26, %v192_v36 }
  0xb7   :  { %v258_v39 = vadd.f32 %v257_v37, %v193_v38 }
  0xb9   :  { %v303_v40 = vmax.f32 %v258_v39, 0.0 }
  0xbb   :  { %401 = vmatmul.f32.gmra.mxu2 %v303_v40  ;;  %466 = vmatmul.f32.gmra.mxu3 %v303_v40  ;;  %v611_v40 = vld [vmem:[%s1358_s4] sm:$0x3]  ;;  %s1214_s4 = smov [#allocation9]  }
  0xbc   :  { %v195_v43 = vpop.f32.mrf.mxu0  ;;  %s1070_s12 = sshll.u32 %s1214_s4, 4  ;;  %s1071_s12 = int_to_ptr.vmem [resolvable:$true] %s1070_s12 }
  0xbd   :  { %v260_v44 = vpop.f32.mrf.mxu1  ;;  %v196_v45 = vadd.f32 %v1263_v26, %v195_v43 }
  0xbf   :  { %v261_v46 = vadd.f32 %v260_v44, %v196_v45  ;;  %v613_v44 = vperm.slane %v611_v40, 0  ;;  %v614_v45 = vperm.slane %v611_v40, 1 }
  0xc1   :  { %v304_v47 = vmax.f32 %v261_v46, 0.0 }
  0xc3   :  { %404 = vmatmul.f32.gmra.mxu2 %v304_v47  ;;  %469 = vmatmul.f32.gmra.mxu3 %v304_v47 }
  0xc4   :  { %v198_v48 = vpop.f32.mrf.mxu0 }
  0xc5   :  { %v263_v49 = vpop.f32.mrf.mxu1  ;;  %v199_v50 = vadd.f32 %v1263_v26, %v198_v48 }
  0xc7   :  { %v264_v51 = vadd.f32 %v263_v49, %v199_v50 }
  0xc9   :  { %v305_v52 = vmax.f32 %v264_v51, 0.0 }
  0xcb   :  { %407 = vmatmul.f32.gmra.mxu2 %v305_v52  ;;  %472 = vmatmul.f32.gmra.mxu3 %v305_v52 }
  0xcc   :  { %v201_v53 = vpop.f32.mrf.mxu0 }
  0xcd   :  { %v266_v54 = vpop.f32.mrf.mxu1  ;;  %v202_v55 = vadd.f32 %v1263_v26, %v201_v53 }
  0xcf   :  { %v267_v56 = vadd.f32 %v266_v54, %v202_v55 }
  0xd1   :  { %v306_v57 = vmax.f32 %v267_v56, 0.0 }
  0xd3   :  { %410 = vmatmul.f32.gmra.mxu2 %v306_v57  ;;  %475 = vmatmul.f32.gmra.mxu3 %v306_v57 }
  0xd4   :  { %v204_v58 = vpop.f32.mrf.mxu0 }
  0xd5   :  { %v269_v59 = vpop.f32.mrf.mxu1  ;;  %v205_v60 = vadd.f32 %v1263_v26, %v204_v58 }
  0xd7   :  { %v270_v61 = vadd.f32 %v269_v59, %v205_v60 }
  0xd9   :  { %v307_v62 = vmax.f32 %v270_v61, 0.0 }
  0xdb   :  { %413 = vmatmul.f32.gmra.mxu2 %v307_v62  ;;  %478 = vmatmul.f32.gmra.mxu3 %v307_v62 }
  0xdc   :  { %v207_v63 = vpop.f32.mrf.mxu0 }
  0xdd   :  { %v272_v0 = vpop.f32.mrf.mxu1  ;;  %v208_v1 = vadd.f32 %v1263_v26, %v207_v63 }
  0xdf   :  { %v273_v2 = vadd.f32 %v272_v0, %v208_v1 }
  0xe1   :  { %v308_v3 = vmax.f32 %v273_v2, 0.0 }
  0xe3   :  { %416 = vmatmul.f32.gmra.mxu2 %v308_v3  ;;  %481 = vmatmul.f32.gmra.mxu3 %v308_v3 }
  0xe4   :  { %v210_v4 = vpop.f32.mrf.mxu0 }
  0xe5   :  { %v275_v5 = vpop.f32.mrf.mxu1  ;;  %v211_v6 = vadd.f32 %v1263_v26, %v210_v4 }
  0xe7   :  { %v276_v7 = vadd.f32 %v275_v5, %v211_v6 }
  0xe9   :  { %v309_v8 = vmax.f32 %v276_v7, 0.0 }
  0xeb   :  { %419 = vmatmul.f32.gmra.mxu2 %v309_v8  ;;  %484 = vmatmul.f32.gmra.mxu3 %v309_v8 }
  0xec   :  { %v213_v9 = vpop.f32.mrf.mxu0 }
  0xed   :  { %v278_v10 = vpop.f32.mrf.mxu1  ;;  %v214_v11 = vadd.f32 %v1263_v26, %v213_v9 }
  0xef   :  { %v279_v12 = vadd.f32 %v278_v10, %v214_v11 }
  0xf1   :  { %v310_v13 = vmax.f32 %v279_v12, 0.0 }
  0xf3   :  { %422 = vmatmul.f32.gmra.mxu2 %v310_v13  ;;  %487 = vmatmul.f32.gmra.mxu3 %v310_v13 }
  0xf4   :  { %v216_v14 = vpop.f32.mrf.mxu0 }
  0xf5   :  { %v217_v15 = vadd.f32 %v1263_v26, %v216_v14  ;;  %v281_v16 = vpop.f32.mrf.mxu1 }
  0xf7   :  { %v282_v17 = vadd.f32 %v281_v16, %v217_v15 }
  0xf9   :  { %v311_v18 = vmax.f32 %v282_v17, 0.0 }
  0xfb   :  { %425 = vmatmul.f32.gmra.mxu2 %v311_v18  ;;  %490 = vmatmul.f32.gmra.mxu3 %v311_v18 }
  0xfc   :  { %v219_v19 = vpop.f32.mrf.mxu0 }
  0xfd   :  { %v220_v20 = vadd.f32 %v1263_v26, %v219_v19  ;;  %v284_v21 = vpop.f32.mrf.mxu1 }
  0xff   :  { %v285_v22 = vadd.f32 %v284_v21, %v220_v20 }
 0x101   :  { %v312_v23 = vmax.f32 %v285_v22, 0.0 }
 0x103   :  { %428 = vmatmul.f32.gmra.mxu2 %v312_v23  ;;  %493 = vmatmul.f32.gmra.mxu3 %v312_v23 }
 0x104   :  { %v222_v24 = vpop.f32.mrf.mxu0 }
 0x105   :  { %v223_v25 = vadd.f32 %v1263_v26, %v222_v24  ;;  %v287_v27 = vpop.f32.mrf.mxu1 }
 0x107   :  { %v288_v28 = vadd.f32 %v287_v27, %v223_v25 }
 0x109   :  { %v313_v29 = vmax.f32 %v288_v28, 0.0 }
 0x10b   :  { %431 = vmatmul.f32.gmra.mxu2 %v313_v29  ;;  %496 = vmatmul.f32.gmra.mxu3 %v313_v29 }
 0x10c   :  { %v225_v30 = vpop.f32.mrf.mxu0 }
 0x10d   :  { %v226_v31 = vadd.f32 %v1263_v26, %v225_v30  ;;  %v290_v32 = vpop.f32.mrf.mxu1 }
 0x10f   :  { %v291_v33 = vadd.f32 %v290_v32, %v226_v31 }
 0x111   :  { %v314_v34 = vmax.f32 %v291_v33, 0.0 }
 0x113   :  { %434 = vmatmul.f32.gmra.mxu2 %v314_v34  ;;  %499 = vmatmul.f32.gmra.mxu3 %v314_v34 }
 0x114   :  { %v228_v35 = vpop.f32.mrf.mxu0 }
 0x115   :  { %v229_v36 = vadd.f32 %v1263_v26, %v228_v35  ;;  %v293_v37 = vpop.f32.mrf.mxu1 }
 0x117   :  { %v294_v38 = vadd.f32 %v293_v37, %v229_v36 }
 0x119   :  { %v315_v39 = vmax.f32 %v294_v38, 0.0 }
 0x11b   :  { %437 = vmatmul.f32.gmra.mxu2 %v315_v39  ;;  %502 = vmatmul.f32.gmra.mxu3 %v315_v39 }
 0x11c   :  { %v231_v41 = vpop.f32.mrf.mxu0 }
 0x11d   :  { %v232_v42 = vadd.f32 %v1263_v26, %v231_v41  ;;  %v296_v43 = vpop.f32.mrf.mxu1 }
 0x11f   :  { %v297_v46 = vadd.f32 %v296_v43, %v232_v42 }
 0x121   :  { %v316_v49 = vmax.f32 %v297_v46, 0.0 }
 0x123   :  { %440 = vmatmul.f32.gmra.mxu2 %v316_v49  ;;  %505 = vmatmul.f32.gmra.mxu3 %v316_v49 }
 0x124   :  { %v234_v54 = vpop.f32.mrf.mxu0 }
 0x125   :  { %v235_v55 = vadd.f32 %v1263_v26, %v234_v54  ;;  %v299_v56 = vpop.f32.mrf.mxu1 }
 0x127   :  { %v300_v59 = vadd.f32 %v299_v56, %v235_v55 }
 0x129   :  { %v317_v63 = vmax.f32 %v300_v59, 0.0  ;;  %v1213_v59 = vmov 0.0  }
 0x12a   :  { %1042 = vst [vmem:[#allocation9 + $0x40] sm:$0xff] %v1213_v59 }
 0x12b   :  { %443 = vmatmul.f32.gmra.mxu2 %v317_v63  ;;  %508 = vmatmul.f32.gmra.mxu3 %v317_v63  ;;  %1043 = vst [vmem:[#allocation9 + $0x48] sm:$0xff] %v1213_v59 }
 0x12c   :  { %1044 = vst [vmem:[#allocation9 + $0x50] sm:$0xff] %v1213_v59 }
 0x12d   :  { %1045 = vst [vmem:[#allocation9 + $0x58] sm:$0xff] %v1213_v59 }
 0x12e   :  { %1046 = vst [vmem:[#allocation9 + $0x60] sm:$0xff] %v1213_v59 }
 0x12f   :  { %1047 = vst [vmem:[#allocation9 + $0x68] sm:$0xff] %v1213_v59 }
 0x130   :  { %1048 = vst [vmem:[#allocation9 + $0x70] sm:$0xff] %v1213_v59 }
 0x131   :  { %1049 = vst [vmem:[#allocation9 + $0x78] sm:$0xff] %v1213_v59 }
 0x132   :  { %1050 = vst [vmem:[#allocation9 + $0x80] sm:$0xff] %v1213_v59 }
 0x133   :  { %1051 = vst [vmem:[#allocation9 + $0x88] sm:$0xff] %v1213_v59 }
 0x134   :  { %1052 = vst [vmem:[#allocation9 + $0x90] sm:$0xff] %v1213_v59 }
 0x135   :  { %1053 = vst [vmem:[#allocation9 + $0x98] sm:$0xff] %v1213_v59 }
 0x136   :  { %v399_v47 = vpop.f32.mrf.mxu2  ;;  %v464_v48 = vpop.f32.mrf.mxu3  ;;  %1054 = vst [vmem:[#allocation9 + $0xa0] sm:$0xff] %v1213_v59 }
 0x137   :  { %v617_v50 = vadd.f32 %v613_v44, %v399_v47  ;;  %v618_v51 = vadd.f32 %v614_v45, %v464_v48  ;;  %1055 = vst [vmem:[#allocation9 + $0xa8] sm:$0xff] %v1213_v59 }
 0x138   :  { %1056 = vst [vmem:[#allocation9 + $0xb0] sm:$0xff] %v1213_v59 }
 0x139   :  { %v1283_v52 = vmax.f32 %v617_v50, 0.0  ;;  %v1285_v53 = vmax.f32 %v618_v51, 0.0  ;;  %1057 = vst [vmem:[#allocation9 + $0xb8] sm:$0xff] %v1213_v59 }
 0x13a   :  { %1058 = vst [vmem:[#allocation9 + $0xc0] sm:$0xff] %v1213_v59 }
 0x13b   :  { %v681_v57 = vmul.f32 %v1283_v52, %v1283_v52  ;;  %v682_v58 = vmul.f32 %v1285_v53, %v1285_v53  ;;  %1059 = vst [vmem:[#allocation9 + $0xc8] sm:$0xff] %v1213_v59 }
 0x13c   :  { %1060 = vst [vmem:[#allocation9 + $0xd0] sm:$0xff] %v1213_v59 }
 0x13d   :  { %v713_v60 = vadd.f32 %v682_v58, %v681_v57  ;;  %1061 = vst [vmem:[#allocation9 + $0xd8] sm:$0xff] %v1213_v59 }
 0x13e   :  { %v402_v61 = vpop.f32.mrf.mxu2  ;;  %v467_v62 = vpop.f32.mrf.mxu3  ;;  %1062 = vst [vmem:[#allocation9 + $0xe0] sm:$0xff] %v1213_v59 }
 0x13f   :  { %v619_v0 = vadd.f32 %v613_v44, %v402_v61  ;;  %v620_v1 = vadd.f32 %v614_v45, %v467_v62  ;;  %714 = vadd.xlane.f32.xlu0 %v713_v60  ;;  %1063 = vst [vmem:[#allocation9 + $0xe8] sm:$0xff] %v1213_v59 }
 0x140   :  { %1064 = vst [vmem:[#allocation9 + $0xf0] sm:$0xff] %v1213_v59 }
 0x141   :  { %v1292_v2 = vmax.f32 %v619_v0, 0.0  ;;  %v1294_v26 = vmax.f32 %v620_v1, 0.0  ;;  %1065 = vst [vmem:[#allocation9 + $0xf8] sm:$0xff] %v1213_v59 }
 0x143   :  { %v683_v3 = vmul.f32 %v1292_v2, %v1292_v2  ;;  %v684_v4 = vmul.f32 %v1294_v26, %v1294_v26 }
 0x145   :  { %v716_v5 = vadd.f32 %v684_v4, %v683_v3 }
 0x146   :  { %v405_v6 = vpop.f32.mrf.mxu2  ;;  %v470_v7 = vpop.f32.mrf.mxu3 }
 0x147   :  { %v621_v8 = vadd.f32 %v613_v44, %v405_v6  ;;  %v622_v9 = vadd.f32 %v614_v45, %v470_v7  ;;  %717 = vadd.xlane.f32.xlu0 %v716_v5 }
 0x149   :  { %v1300_v10 = vmax.f32 %v621_v8, 0.0  ;;  %v1302_v11 = vmax.f32 %v622_v9, 0.0 }
 0x14b   :  { %v685_v12 = vmul.f32 %v1300_v10, %v1300_v10  ;;  %v686_v13 = vmul.f32 %v1302_v11, %v1302_v11 }
 0x14d   :  { %v719_v14 = vadd.f32 %v686_v13, %v685_v12 }
 0x14e   :  { %v408_v15 = vpop.f32.mrf.mxu2  ;;  %v473_v16 = vpop.f32.mrf.mxu3 }
 0x14f   :  { %v623_v17 = vadd.f32 %v613_v44, %v408_v15  ;;  %v624_v18 = vadd.f32 %v614_v45, %v473_v16  ;;  %720 = vadd.xlane.f32.xlu1 %v719_v14 }
 0x151   :  { %v1308_v19 = vmax.f32 %v623_v17, 0.0  ;;  %v1310_v20 = vmax.f32 %v624_v18, 0.0 }
 0x153   :  { %v687_v21 = vmul.f32 %v1308_v19, %v1308_v19  ;;  %v688_v22 = vmul.f32 %v1310_v20, %v1310_v20 }
 0x155   :  { %v722_v23 = vadd.f32 %v688_v22, %v687_v21 }
 0x156   :  { %v411_v24 = vpop.f32.mrf.mxu2  ;;  %v476_v25 = vpop.f32.mrf.mxu3 }
 0x157   :  { %723 = vadd.xlane.f32.xlu1 %v722_v23 }
 0x15e   :  { %v414_v27 = vpop.f32.mrf.mxu2  ;;  %v479_v28 = vpop.f32.mrf.mxu3 }
 0x166   :  { %v417_v29 = vpop.f32.mrf.mxu2  ;;  %v482_v30 = vpop.f32.mrf.mxu3 }
 0x16e   :  { %v420_v31 = vpop.f32.mrf.mxu2  ;;  %v485_v32 = vpop.f32.mrf.mxu3 }
 0x176   :  { %v423_v33 = vpop.f32.mrf.mxu2  ;;  %v488_v34 = vpop.f32.mrf.mxu3 }
 0x17e   :  { %v491_v35 = vpop.f32.mrf.mxu3  ;;  %v426_v36 = vpop.f32.mrf.mxu2 }
 0x186   :  { %v494_v37 = vpop.f32.mrf.mxu3  ;;  %v429_v38 = vpop.f32.mrf.mxu2 }
 0x18e   :  { %v497_v39 = vpop.f32.mrf.mxu3  ;;  %v432_v40 = vpop.f32.mrf.mxu2 }
 0x196   :  { %v500_v41 = vpop.f32.mrf.mxu3  ;;  %v435_v42 = vpop.f32.mrf.mxu2 }
 0x19e   :  { %v438_v44 = vpop.f32.mrf.mxu2  ;;  %v503_v46 = vpop.f32.mrf.mxu3 }
 0x1a6   :  { %v441_v50 = vpop.f32.mrf.mxu2  ;;  %v506_v51 = vpop.f32.mrf.mxu3 }
 0x1ae   :  { %v444_v62 = vpop.f32.mrf.mxu2  ;;  %v509_v63 = vpop.f32.mrf.mxu3 }
 0x1b2   :  { %v715_v43 = vpop.xlane.xlu0 %714 }
 0x1b3   :  { %v761_v45 = vmax.f32 %v715_v43, 1e-24 }
 0x1b5   :  { %1096 = vrsqrt.f32 %v761_v45  ;;  %vm783_vm1 = vweird.f32 %v761_v45 }
 0x1ba   :  { %v718_v47 = vpop.xlane.xlu0 %717 }
 0x1bb   :  { %v1097_v48 = vpop.eup %1096  ;;  %v762_v49 = vmax.f32 %v718_v47, 1e-24 }
 0x1bc   :  { %v778_v54 = vmul.f32 %v1097_v48, %v761_v45  ;;  %vm784_vm0 = vweird.f32 %v1097_v48 }
 0x1bd   :  { %1098 = vrsqrt.f32 %v762_v49  ;;  %vm785_vm2 = vmor %vm783_vm1, %vm784_vm0  ;;  %vm793_vm4 = vweird.f32 %v762_v49 }
 0x1be   :  { %v779_v55 = vmul.f32 %v1097_v48, %v778_v54 }
 0x1c0   :  { %v780_v56 = vmul.f32 0.5, %v779_v55 }
 0x1c2   :  { %v781_v57 = vsub.f32 1.5, %v780_v56  ;;  %v721_v58 = vpop.xlane.xlu1 %720 }
 0x1c3   :  { %v1099_v60 = vpop.eup %1098  ;;  %v763_v61 = vmax.f32 %v721_v58, 1e-24 }
 0x1c4   :  { %v782_v0 = vmul.f32 %v1097_v48, %v781_v57  ;;  %v788_v1 = vmul.f32 %v1099_v60, %v762_v49  ;;  %vm794_vm3 = vweird.f32 %v1099_v60 }
 0x1c5   :  { %1100 = vrsqrt.f32 %v763_v61  ;;  %vm795_vm5 = vmor %vm793_vm4, %vm794_vm3  ;;  %vm803_vm7 = vweird.f32 %v763_v61 }
 0x1c6   :  { %v786_v3 = vsel %vm785_vm2, %v1097_v48, %v782_v0  ;;  %v789_v4 = vmul.f32 %v1099_v60, %v788_v1 }
 0x1c7   :  { %v937_v5 = vmul.f32 %v786_v3, %v1283_v52  ;;  %v938_v6 = vmul.f32 %v786_v3, %v1285_v53 }
 0x1c8   :  { %v790_v7 = vmul.f32 0.5, %v789_v4 }
 0x1c9   :  { %1034 = vst [vmem:[#allocation9] sm:$0xff] %v937_v5 }
 0x1ca   :  { %1035 = vst [vmem:[#allocation9 + $0x8] sm:$0xff] %v938_v6  ;;  %v791_v8 = vsub.f32 1.5, %v790_v7  ;;  %v724_v9 = vpop.xlane.xlu1 %723 }
 0x1cb   :  { %v1101_v12 = vpop.eup %1100  ;;  %v764_v13 = vmax.f32 %v724_v9, 1e-24 }
 0x1cc   :  { %v792_v14 = vmul.f32 %v1099_v60, %v791_v8  ;;  %v798_v15 = vmul.f32 %v1101_v12, %v763_v61  ;;  %vm804_vm6 = vweird.f32 %v1101_v12 }
 0x1cd   :  { %1102 = vrsqrt.f32 %v764_v13  ;;  %vm805_vm8 = vmor %vm803_vm7, %vm804_vm6  ;;  %vm813_vm10 = vweird.f32 %v764_v13 }
 0x1ce   :  { %v796_v52 = vsel %vm795_vm5, %v1099_v60, %v792_v14  ;;  %v799_v53 = vmul.f32 %v1101_v12, %v798_v15 }
 0x1cf   :  { %v939_v16 = vmul.f32 %v796_v52, %v1292_v2  ;;  %v940_v17 = vmul.f32 %v796_v52, %v1294_v26 }
 0x1d0   :  { %v800_v18 = vmul.f32 0.5, %v799_v53 }
 0x1d1   :  { %1036 = vst [vmem:[#allocation9 + $0x10] sm:$0xff] %v939_v16 }
 0x1d2   :  { %1037 = vst [vmem:[#allocation9 + $0x18] sm:$0xff] %v940_v17  ;;  %v801_v21 = vsub.f32 1.5, %v800_v18 }
 0x1d3   :  { %v1103_v22 = vpop.eup %1102 }
 0x1d4   :  { %v802_v23 = vmul.f32 %v1101_v12, %v801_v21  ;;  %v808_v24 = vmul.f32 %v1103_v22, %v764_v13  ;;  %vm814_vm9 = vweird.f32 %v1103_v22 }
 0x1d5   :  { %vm815_vm11 = vmor %vm813_vm10, %vm814_vm9 }
 0x1d6   :  { %v806_v2 = vsel %vm805_vm8, %v1101_v12, %v802_v23  ;;  %v809_v26 = vmul.f32 %v1103_v22, %v808_v24 }
 0x1d7   :  { %v941_v25 = vmul.f32 %v806_v2, %v1300_v10  ;;  %v942_v27 = vmul.f32 %v806_v2, %v1302_v11 }
 0x1d8   :  { %v810_v28 = vmul.f32 0.5, %v809_v26 }
 0x1d9   :  { %1038 = vst [vmem:[#allocation9 + $0x20] sm:$0xff] %v941_v25 }
 0x1da   :  { %1039 = vst [vmem:[#allocation9 + $0x28] sm:$0xff] %v942_v27  ;;  %v811_v29 = vsub.f32 1.5, %v810_v28 }
 0x1dc   :  { %v812_v30 = vmul.f32 %v1103_v22, %v811_v29 }
 0x1de   :  { %v816_v10 = vsel %vm815_vm11, %v1103_v22, %v812_v30 }
 0x1df   :  { %v943_v11 = vmul.f32 %v816_v10, %v1308_v19  ;;  %v944_v31 = vmul.f32 %v816_v10, %v1310_v20 }
 0x1e1   :  { %1040 = vst [vmem:[#allocation9 + $0x30] sm:$0xff] %v943_v11 }
 0x1e2   :  { %1041 = vst [vmem:[#allocation9 + $0x38] sm:$0xff] %v944_v31 }
 0x1e3   :  { %1078 = dma.vmem_to_hbm [thread:$0]  %s1071_s12, 4096, %s1073_s15, [#allocation5], %s1210_s30, %s1210_s30, %s1211_s6  }
 0x1e4   :  { %1204 = dma.done.wait [#allocation5], 4096  }
 0x1e5   :  { %1205 = vsyncadd [#allocation5], 4294963200 }
 0x1e6   :  { %1083 = vsyncpa [#allocation4], 1 }
 0x1e7   :  { %1084 = vsyncpa [#allocation7], 1 }
 0x1e8   :  { %1085 = vsyncpa [#allocation5], 1 }

</bundles_post_ra>
